<compile_context>
chip_gen: v7x
topology: tpu7x:2x2x1
jax: 0.10.0
libtpu: 0.0.40
codegen_flags: <defaults>
</compile_context>

<pallas_src>
import functools

import jax
import jax.numpy as jnp
from jax import lax
from jax.experimental import pallas as pl
from jax.experimental.pallas import tpu as pltpu


def _round_up(a, b):
    return (a + b - 1) // b * b


def _self_attention_kernel(gamma_ref,   # SMEM (1,) f32
                           x_ref,       # VMEM (1, C, N_pad) f32  (full batch element, channel-major)
                           w_ref,       # VMEM (2*Cq+C, C) bf16   fused [Q|K|V] projection weights
                           b_ref,       # VMEM (2*Cq+C, 1) f32    fused [Q|K|V] biases
                           out_ref,     # VMEM (1, C, Tq) f32
                           q_s,         # VMEM (Cq, N_pad) f32  scratch: Q cache (lane-dense)
                           k_s,         # VMEM (Cq, N_pad) bf16 scratch: K cache (lane-dense)
                           v_s,         # VMEM (C,  N_pad) bf16 scratch: V cache (lane-dense)
                           *, n_valid):
    qi = pl.program_id(1)
    c, n_pad = v_s.shape
    cq = q_s.shape[0]
    tq = out_ref.shape[2]

    # ---- once per batch element: fused QKV projection, cached in VMEM ------
    @pl.when(qi == 0)
    def _project():
        x_bf = x_ref[0].astype(jnp.bfloat16)                                 # (C, N_pad)
        qkv = jnp.dot(w_ref[...], x_bf,
                      preferred_element_type=jnp.float32) + b_ref[...]       # (fdim, N_pad) f32
        # Sublane (row) slices at multiples of Cq (= C//8, itself a multiple of 8).
        q_s[...] = qkv[:cq]                                                  # (Cq, N_pad) f32
        k_s[...] = qkv[cq:2 * cq].astype(jnp.bfloat16)                       # (Cq, N_pad) bf16
        v_s[...] = qkv[2 * cq:].astype(jnp.bfloat16)                         # (C,  N_pad) bf16

    # ---- this query tile ----------------------------------------------------
    col0 = pl.multiple_of(qi * tq, tq)
    # Small f32 transpose (Cq, Tq) -> (Tq, Cq), then cast: clean MXU LHS.
    q_t = jnp.transpose(q_s[:, pl.ds(col0, tq)]).astype(jnp.bfloat16)        # (Tq, Cq)

    # energy[i, j] = sum_c q[c, col0+i] * k[c, j]  -> (Tq, N_pad), f32 accumulate.
    energy = jnp.dot(q_t, k_s[...], preferred_element_type=jnp.float32)

    if n_valid != n_pad:   # static: only traced when the key axis is padded
        col_ids = lax.broadcasted_iota(jnp.int32, energy.shape, 1)
        energy = jnp.where(col_ids < n_valid, energy, -1e30)

    # Row softmax with DEFERRED normalization: keep attn un-normalized, scale
    # the (C, Tq) output instead of the (Tq, N_pad) attention matrix.
    m = jnp.max(energy, axis=-1, keepdims=True)                              # (Tq, 1)
    attn = jnp.exp(energy - m).astype(jnp.bfloat16)                          # (Tq, N_pad), un-normalized

    # Row denominator produced directly in (1, Tq) orientation via a tiny MXU dot
    # (avoids a sublane->lane relayout of the (Tq, 1) sum).
    ones_row = jnp.ones((1, n_pad), jnp.bfloat16)
    l_row = lax.dot_general(ones_row, attn, (((1,), (1,)), ((), ())),
                            preferred_element_type=jnp.float32)              # (1, Tq)

    # out[c, i] = sum_j v[c, j] * attn[i, j]  -> (C, Tq); attn contracted on its
    # last axis against lane-dense V, so the NxN matrix is never transposed.
    o = lax.dot_general(v_s[...], attn, (((1,), (1,)), ((), ())),
                        preferred_element_type=jnp.float32)                  # (C, Tq)

    # gamma and 1/l folded into one (1, Tq) scale -> single broadcast multiply.
    scale = gamma_ref[0] * pl.reciprocal(l_row, approx=True)                 # (1, Tq)
    x_t = x_ref[0, :, pl.ds(col0, tq)]                                       # (C, Tq) f32 residual
    out_ref[0] = o * scale + x_t


def self_attention(x_nchw, params, *, tq=128):
    """x_nchw: (B, C, W, H) float32.  Returns (B, C, W, H) float32.

    tq is the query-tile width (lane axis of the output block) and is rounded
    to a multiple of 128.  128-256 is a safe default (v7x: keep <= 256 for its
    64 MiB VMEM); on v6e, 256-512 amortizes per-grid-step overhead better.
    """
    B, C, W, H = x_nchw.shape
    N = W * H
    Cq = params["wq"].shape[0]
    fdim = C + 2 * Cq

    # Query tile: multiple of 128 lanes; spatial axis padded to a tile multiple
    # (padded key columns are masked inside the kernel, padded query columns
    # are sliced off below).  No (N, N) fallback for ragged N.
    tq = max(128, (int(tq) // 128) * 128)
    tq = min(tq, _round_up(N, 128))
    N_pad = _round_up(N, tq)

    # Channel-major activations: reshape only, no HBM transpose traffic.
    x_cm = x_nchw.reshape(B, C, N).astype(jnp.float32)
    if N_pad != N:
        x_cm = jnp.pad(x_cm, ((0, 0), (0, 0), (0, N_pad - N)))

    # Fused projection weights/biases, ordered [Q | K | V] along output rows.
    w_fused = jnp.concatenate(
        [params["wq"], params["wk"], params["wv"]], axis=0).astype(jnp.bfloat16)   # (fdim, C)
    b_fused = jnp.concatenate(
        [params["bq"].reshape(-1), params["bk"].reshape(-1),
         params["bv"].reshape(-1)]).reshape(fdim, 1).astype(jnp.float32)           # (fdim, 1)

    flops = 2 * B * (fdim * C * N_pad + Cq * N_pad * N_pad + (C + 1) * N_pad * N_pad)
    bytes_accessed = 8 * B * C * N_pad + 2 * fdim * C + 4 * fdim + 4

    kernel = functools.partial(_self_attention_kernel, n_valid=N)

    out_cm = pl.pallas_call(
        kernel,
        out_shape=jax.ShapeDtypeStruct((B, C, N_pad), jnp.float32),
        grid_spec=pltpu.PrefetchScalarGridSpec(
            num_scalar_prefetch=0,
            grid=(B, N_pad // tq),
            in_specs=[
                pl.BlockSpec(memory_space=pltpu.MemorySpace.SMEM),        # gamma
                pl.BlockSpec((1, C, N_pad), lambda b, q: (b, 0, 0)),      # x (full element; re-DMA'd only per batch)
                pl.BlockSpec((fdim, C), lambda b, q: (0, 0)),             # fused W (bf16)
                pl.BlockSpec((fdim, 1), lambda b, q: (0, 0)),             # fused bias (f32)
            ],
            out_specs=pl.BlockSpec((1, C, tq), lambda b, q: (b, 0, q)),
            scratch_shapes=[
                pltpu.VMEM((Cq, N_pad), jnp.float32),     # Q cache
                pltpu.VMEM((Cq, N_pad), jnp.bfloat16),    # K cache (lane-dense)
                pltpu.VMEM((C, N_pad), jnp.bfloat16),     # V cache (lane-dense)
            ],
        ),
        compiler_params=pltpu.CompilerParams(
            # Query-tile axis stays "arbitrary": QKV scratch is filled at tile 0
            # of each batch element and reused by the remaining tiles.
            dimension_semantics=("parallel", "arbitrary"),
            # Explicit VMEM budget: fits v7x's 64 MiB physical VMEM and lifts
            # the low default scoped limits on v5e/v6e.
            vmem_limit_bytes=64 * 1024 * 1024,
        ),
        cost_estimate=pl.CostEstimate(flops=flops,
                                      transcendentals=B * N_pad * N_pad,
                                      bytes_accessed=bytes_accessed),
    )(params["gamma"], x_cm, w_fused, b_fused)

    if N_pad != N:
        out_cm = out_cm[:, :, :N]
    return out_cm.reshape(B, C, W, H)


def _reference(x_nchw, params):
    """Pure-JAX f32 reference mirroring the PyTorch forward."""
    B, C, W, H = x_nchw.shape
    N = W * H
    x = x_nchw.reshape(B, C, N)
    q = jnp.einsum("oc,bcn->bon", params["wq"], x) + params["bq"][None]   # (B, Cq, N)
    k = jnp.einsum("oc,bcn->bon", params["wk"], x) + params["bk"][None]
    v = jnp.einsum("oc,bcn->bon", params["wv"], x) + params["bv"][None]   # (B, C, N)
    energy = jnp.einsum("bci,bcj->bij", q, k)                             # (B, N, N)
    attn = jax.nn.softmax(energy, axis=-1)
    out = jnp.einsum("bcj,bij->bci", v, attn)                             # (B, C, N)
    out = params["gamma"][0] * out + x
    return out.reshape(B, C, W, H)


if __name__ == "__main__":
    # Small shapes consistent with the module (in_dim must be >= 8 for in_dim//8).
    B, C, W, H = 2, 64, 16, 16          # N = 256 -> 2 query tiles of 128
    Cq = C // 8

    key = jax.random.PRNGKey(0)
    kx, kwq, kbq, kwk, kbk, kwv, kbv = jax.random.split(key, 7)

    x = jax.random.normal(kx, (B, C, W, H), dtype=jnp.float32)

    scale = 0.1
    params = {
        "wq": scale * jax.random.normal(kwq, (Cq, C), dtype=jnp.float32),
        "bq": scale * jax.random.normal(kbq, (Cq, 1), dtype=jnp.float32),
        "wk": scale * jax.random.normal(kwk, (Cq, C), dtype=jnp.float32),
        "bk": scale * jax.random.normal(kbk, (Cq, 1), dtype=jnp.float32),
        "wv": scale * jax.random.normal(kwv, (C, C), dtype=jnp.float32),
        "bv": scale * jax.random.normal(kbv, (C, 1), dtype=jnp.float32),
        # Module init sets gamma = 0 (output == input); use a nonzero value so
        # the attention path is actually exercised.
        "gamma": jnp.array([0.5], dtype=jnp.float32),
    }

    out = self_attention(x, params)
    out = jax.block_until_ready(out)

    ref = _reference(x, params)
    assert out.shape == (B, C, W, H)
    # bf16 MXU operands + approx reciprocal -> slightly looser tolerance vs f32 ref.
    assert jnp.allclose(out, ref, atol=3e-2, rtol=3e-2), "mismatch vs reference"

    print("KERNEL_OK")
</pallas_src>

<mosaic_0001>
module attributes {stable_mosaic.version = 11 : i64} {
  func.func @_self_attention_kernel(%arg0: i32, %arg1: i32, %arg2: memref<1xf32, #tpu.memory_space<smem>>, %arg3: memref<1x64x256xf32, #tpu.memory_space<vmem>>, %arg4: memref<80x64xbf16, #tpu.memory_space<vmem>>, %arg5: memref<80x1xf32, #tpu.memory_space<vmem>>, %arg6: memref<1x64x128xf32, #tpu.memory_space<vmem>>, %arg7: memref<8x256xf32, #tpu.memory_space<vmem>>, %arg8: memref<8x256xbf16, #tpu.memory_space<vmem>>, %arg9: memref<64x256xbf16, #tpu.memory_space<vmem>>) attributes {dimension_semantics = [#tpu.dimension_semantics<parallel>, #tpu.dimension_semantics<arbitrary>], iteration_bounds = array<i64: 2, 2>, scalar_prefetch = 0 : i64, scratch_operands = 3 : i64, tpu.core_type = #tpu.core_type<tc>, window_params = [{transform_indices = @transform_0, window_bounds = array<i64: 1>}, {transform_indices = @transform_1, window_bounds = array<i64: 1, 64, 256>}, {pipeline_mode = #tpu.pipeline_mode<synchronous>, transform_indices = @transform_2, window_bounds = array<i64: 80, 64>}, {pipeline_mode = #tpu.pipeline_mode<synchronous>, transform_indices = @transform_3, window_bounds = array<i64: 80, 1>}, {transform_indices = @transform_4, window_bounds = array<i64: 1, 64, 128>}]} {
    %c0_i32 = arith.constant 0 : i32
    %0 = arith.cmpi eq, %arg1, %c0_i32 : i32
    %1 = arith.extui %0 : i1 to i32
    %c0_i32_0 = arith.constant 0 : i32
    %2 = arith.cmpi ne, %1, %c0_i32_0 : i32
    scf.if %2 {
      %c0_15 = arith.constant 0 : index
      %c0_16 = arith.constant 0 : index
      %c0_17 = arith.constant 0 : index
      %34 = vector.load %arg3[%c0_15, %c0_16, %c0_17] : memref<1x64x256xf32, #tpu.memory_space<vmem>>, vector<1x64x256xf32>
      %35 = vector.shape_cast %34 : vector<1x64x256xf32> to vector<64x256xf32>
      %36 = arith.truncf %35 : vector<64x256xf32> to vector<64x256xbf16>
      %c0_18 = arith.constant 0 : index
      %c0_19 = arith.constant 0 : index
      %37 = vector.load %arg4[%c0_18, %c0_19] : memref<80x64xbf16, #tpu.memory_space<vmem>>, vector<80x64xbf16>
      %cst_20 = arith.constant dense<0.000000e+00> : vector<80x256xf32>
      %38 = tpu.matmul %37, %36, %cst_20 {dimension_numbers = #tpu.dot_dimension_numbers<[1], [0], [0], [1], [0, 0, 1, 1], [], []>} : vector<80x64xbf16>, vector<64x256xbf16>, vector<80x256xf32> -> vector<80x256xf32>
      %c0_21 = arith.constant 0 : index
      %c0_22 = arith.constant 0 : index
      %39 = vector.load %arg5[%c0_21, %c0_22] : memref<80x1xf32, #tpu.memory_space<vmem>>, vector<80x1xf32>
      %40 = vector.broadcast %39 : vector<80x1xf32> to vector<80x256xf32>
      %41 = arith.addf %38, %40 : vector<80x256xf32>
      %42 = vector.extract_strided_slice %41 {offsets = [0, 0], sizes = [8, 256], strides = [1, 1]} : vector<80x256xf32> to vector<8x256xf32>
      %c0_23 = arith.constant 0 : index
      %c0_24 = arith.constant 0 : index
      %43 = vector.load %arg7[%c0_23, %c0_24] : memref<8x256xf32, #tpu.memory_space<vmem>>, vector<8x256xf32>
      tpu.vector_store %arg7[%c0_23, %c0_24], %42 {strides = array<i32>} : memref<8x256xf32, #tpu.memory_space<vmem>>, vector<8x256xf32>,
      %44 = vector.extract_strided_slice %41 {offsets = [8, 0], sizes = [8, 256], strides = [1, 1]} : vector<80x256xf32> to vector<8x256xf32>
      %45 = arith.truncf %44 : vector<8x256xf32> to vector<8x256xbf16>
      %c0_25 = arith.constant 0 : index
      %c0_26 = arith.constant 0 : index
      %46 = vector.load %arg8[%c0_25, %c0_26] : memref<8x256xbf16, #tpu.memory_space<vmem>>, vector<8x256xbf16>
      tpu.vector_store %arg8[%c0_25, %c0_26], %45 {strides = array<i32>} : memref<8x256xbf16, #tpu.memory_space<vmem>>, vector<8x256xbf16>,
      %47 = vector.extract_strided_slice %41 {offsets = [16, 0], sizes = [64, 256], strides = [1, 1]} : vector<80x256xf32> to vector<64x256xf32>
      %48 = arith.truncf %47 : vector<64x256xf32> to vector<64x256xbf16>
      %c0_27 = arith.constant 0 : index
      %c0_28 = arith.constant 0 : index
      %49 = vector.load %arg9[%c0_27, %c0_28] : memref<64x256xbf16, #tpu.memory_space<vmem>>, vector<64x256xbf16>
      tpu.vector_store %arg9[%c0_27, %c0_28], %48 {strides = array<i32>} : memref<64x256xbf16, #tpu.memory_space<vmem>>, vector<64x256xbf16>,
    } else {
    }
    %c128_i32 = arith.constant 128 : i32
    %3 = arith.muli %arg1, %c128_i32 : i32
    %4 = tpu.assume_multiple %3, 128 : i32
    %c0 = arith.constant 0 : index
    %5 = arith.index_cast %4 : i32 to index
    %6 = vector.load %arg7[%c0, %5] : memref<8x256xf32, #tpu.memory_space<vmem>>, vector<8x128xf32>
    %7 = tpu.transpose %6, [1, 0] : vector<8x128xf32> -> vector<128x8xf32>
    %8 = arith.truncf %7 : vector<128x8xf32> to vector<128x8xbf16>
    %c0_1 = arith.constant 0 : index
    %c0_2 = arith.constant 0 : index
    %9 = vector.load %arg8[%c0_1, %c0_2] : memref<8x256xbf16, #tpu.memory_space<vmem>>, vector<8x256xbf16>
    %cst = arith.constant dense<0.000000e+00> : vector<128x256xf32>
    %10 = tpu.matmul %8, %9, %cst {dimension_numbers = #tpu.dot_dimension_numbers<[1], [0], [0], [1], [0, 0, 1, 1], [], []>} : vector<128x8xbf16>, vector<8x256xbf16>, vector<128x256xf32> -> vector<128x256xf32>
    %cst_3 = arith.constant dense<0xFF800000> : vector<128xf32>
    %11 = vector.multi_reduction <maximumf>, %10, %cst_3 [1] : vector<128x256xf32> to vector<128xf32>
    %12 = vector.shape_cast %11 : vector<128xf32> to vector<128x1xf32>
    %13 = vector.broadcast %12 : vector<128x1xf32> to vector<128x256xf32>
    %14 = arith.subf %10, %13 : vector<128x256xf32>
    %15 = math.exp %14 : vector<128x256xf32>
    %16 = arith.truncf %15 : vector<128x256xf32> to vector<128x256xbf16>
    %cst_4 = arith.constant 1.000000e+00 : bf16
    %17 = vector.broadcast %cst_4 : bf16 to vector<1x256xbf16>
    %cst_5 = arith.constant dense<0.000000e+00> : vector<1x128xf32>
    %18 = tpu.matmul %17, %16, %cst_5 {dimension_numbers = #tpu.dot_dimension_numbers<[1], [1], [0], [0], [0, 0, 1, 0], [], []>} : vector<1x256xbf16>, vector<128x256xbf16>, vector<1x128xf32> -> vector<1x128xf32>
    %c0_6 = arith.constant 0 : index
    %c0_7 = arith.constant 0 : index
    %19 = vector.load %arg9[%c0_6, %c0_7] : memref<64x256xbf16, #tpu.memory_space<vmem>>, vector<64x256xbf16>
    %cst_8 = arith.constant dense<0.000000e+00> : vector<64x128xf32>
    %20 = tpu.matmul %19, %16, %cst_8 {dimension_numbers = #tpu.dot_dimension_numbers<[1], [1], [0], [0], [0, 0, 1, 0], [], []>} : vector<64x256xbf16>, vector<128x256xbf16>, vector<64x128xf32> -> vector<64x128xf32>
    %c0_9 = arith.constant 0 : index
    %21 = memref.load %arg2[%c0_9] : memref<1xf32, #tpu.memory_space<smem>>
    %22 = tpu.reciprocal %18 {approx = true} : vector<1x128xf32> -> vector<1x128xf32>
    %23 = vector.broadcast %21 : f32 to vector<1x128xf32>
    %24 = arith.mulf %23, %22 : vector<1x128xf32>
    %c0_10 = arith.constant 0 : index
    %c0_11 = arith.constant 0 : index
    %25 = arith.index_cast %4 : i32 to index
    %26 = vector.load %arg3[%c0_10, %c0_11, %25] : memref<1x64x256xf32, #tpu.memory_space<vmem>>, vector<1x64x128xf32>
    %27 = vector.shape_cast %26 : vector<1x64x128xf32> to vector<64x128xf32>
    %28 = vector.broadcast %24 : vector<1x128xf32> to vector<64x128xf32>
    %29 = arith.mulf %20, %28 : vector<64x128xf32>
    %30 = arith.addf %29, %27 : vector<64x128xf32>
    %c0_12 = arith.constant 0 : index
    %c0_13 = arith.constant 0 : index
    %c0_14 = arith.constant 0 : index
    %31 = vector.load %arg6[%c0_12, %c0_13, %c0_14] : memref<1x64x128xf32, #tpu.memory_space<vmem>>, vector<1x64x128xf32>
    %32 = vector.shape_cast %31 : vector<1x64x128xf32> to vector<64x128xf32>
    %33 = vector.shape_cast %30 : vector<64x128xf32> to vector<1x64x128xf32>
    tpu.vector_store %arg6[%c0_12, %c0_13, %c0_14], %33 {strides = array<i32>} : memref<1x64x128xf32, #tpu.memory_space<vmem>>, vector<1x64x128xf32>,
    return
  }
  func.func @transform_0(%arg0: i32, %arg1: i32) -> i32 {
    %c0_i32 = arith.constant 0 : i32
    %c0_i32_0 = arith.constant 0 : i32
    return %c0_i32 : i32
  }
  func.func @transform_1(%arg0: i32, %arg1: i32) -> (i32, i32, i32) {
    %c0_i32 = arith.constant 0 : i32
    %c0_i32_0 = arith.constant 0 : i32
    %c0_i32_1 = arith.constant 0 : i32
    return %arg0, %c0_i32, %c0_i32_0 : i32, i32, i32
  }
  func.func @transform_2(%arg0: i32, %arg1: i32) -> (i32, i32) {
    %c0_i32 = arith.constant 0 : i32
    %c0_i32_0 = arith.constant 0 : i32
    %c0_i32_1 = arith.constant 0 : i32
    return %c0_i32, %c0_i32_0 : i32, i32
  }
  func.func @transform_3(%arg0: i32, %arg1: i32) -> (i32, i32) {
    %c0_i32 = arith.constant 0 : i32
    %c0_i32_0 = arith.constant 0 : i32
    %c0_i32_1 = arith.constant 0 : i32
    return %c0_i32, %c0_i32_0 : i32, i32
  }
  func.func @transform_4(%arg0: i32, %arg1: i32) -> (i32, i32, i32) {
    %c0_i32 = arith.constant 0 : i32
    %c0_i32_0 = arith.constant 0 : i32
    return %arg0, %c0_i32, %arg1 : i32, i32, i32
  }
}

</mosaic_0001>

<bundles_post_ra>
// kernel: tpu_custom_call.1
= control target key start
LH: loop header
LB: loop body
LE: loop exit
PB: predicated region body
PF: predicated region fallthrough
CT: control target
= control target key end

     0   :  { %s2175_s0 = inlined_call_operand.<no memory space> [shape: f32[1], index: 0, kind: input, shape index: {}]   ;;  %s2176_s1 = inlined_call_operand.hbm [shape: f32[2,64,256], index: 1, kind: input, shape index: {}]   ;;  %s2177_s2 = inlined_call_operand.hbm [shape: bf16[80,64], index: 2, kind: input, shape index: {}]   ;;  %s2178_s3 = inlined_call_operand.hbm [shape: f32[80,1], index: 3, kind: input, shape index: {}]   ;;  %s2179_s4 = inlined_call_operand.hbm [shape: f32[2,64,256], index: 4, kind: output, shape index: {}]  }
   0x1   :  { %2189 = sst [smem:[#allocation20_spill]] %s2177_s2 }
   0x2   :  { %2190 = sst [smem:[#allocation21_spill]] %s2178_s3 }
   0x3   :  { %9 = sst [smem:[#allocation5]] %s2175_s0 }
   0x4   :  { %10 = vsyncpa [#allocation7], 0 }
   0x5   :  { %12 = vsyncpa [#allocation7 + $0x1], 0 }
   0x6   :  { %13 = vsyncpa [#allocation10], 0 }
   0x7   :  { %14 = vsyncpa [#allocation8], 0 }
   0x8   :  { %16 = vsyncpa [#allocation8 + $0x1], 0  ;;  %s1671_s17 = smov 0   ;;  %s1673_s18 = smov 0  }
   0x9   :  { %s1675_s19 = smov 0   ;;  %s1677_s20 = smov 0  }
   0xa   :  { %s1679_s21 = smov 0   ;;  %s1681_s22 = smov 0  }
   0xb   :  { %s1683_s23 = smov 0   ;;  %s1685_s0 = smov 0  }
   0xc   :  { %s1687_s24 = smov 0   ;;  %s1689_s25 = smov 0  }
   0xd   :  { %s1691_s26 = smov 0  }
   0xe LB: > { %2191 = sst [smem:[#allocation16_spill]] %s1585_s17  ;;  %s1147_s27 = sadd.s32 4294967295, %s1625_s26   ;;  %s1625_s26 = sphi %s1691_s26, %s22_s26   ;;  %s1621_s25 = sphi %s1689_s25, %s2222_s25   ;;  %s1617_s24 = sphi %s1687_s24, %s2214_s24   ;;  %s1613_s0 = sphi %s1685_s0, %s2221_s0   ;;  %s1609_s23 = sphi %s1683_s23, %s2213_s23   ;;  %s1605_s22 = sphi %s1681_s22, %s2220_s22   ;;  %s1601_s21 = sphi %s1679_s21, %s2219_s21   ;;  %s1597_s20 = sphi %s1677_s20, %s2218_s20   ;;  %s1593_s19 = sphi %s1675_s19, %s2217_s19   ;;  %s1589_s18 = sphi %s1673_s18, %s2216_s18   ;;  %s1585_s17 = sphi %s1671_s17, %s2215_s17  }
   0xf   : > { %2192 = sst [smem:[#allocation17_spill]] %s1617_s24  ;;  %s1148_s28 = sadd.s32 4294967294, %s1625_s26  }
  0x10   : > { %p75_p0 = scmp.ne.s32.totalorder %s1601_s21, %s1597_s20  ;;  %p1727_p1 = scmp.eq.s32.totalorder %s1147_s27, 0 }
  0x11   : > { %p142_p2 = scmp.ne.s32.totalorder %s1593_s19, %s1589_s18  ;;  %p143_p4 = scmp.eq.s32.totalorder %s1147_s27, 3 }
  0x12   : > { %s2193_s29 = scalar_select %p1727_p1, 1, 0 }
  0x13   : > { %p1736_p3 = por %p1727_p1, %p75_p0  ;;  %p148_p5 = scmp.ne.s32.totalorder %s1589_s18, %s1585_s17 }
  0x14   : > { %p149_p6 = scmp.eq.s32.totalorder %s1148_s28, 3  ;;  %p1742_p7 = por %p143_p4, %p142_p2 }
  0x15   : > { %s2194_s5 = scalar_select %p1736_p3, 1, 0 }
  0x16   : > { %s2195_s6 = scalar_select %p1742_p7, 1, 0 }
  0x17   : > { %p1149_p8 = scmp.ge.s32.totalorder %s1625_s26, 1  ;;  %p1747_p9 = por %p149_p6, %p148_p5 }
  0x18   : > { %p156_p10 = scmp.lt.s32.totalorder %s1625_s26, 5  ;;  %s1627_s9 = smov [#allocation9]  }
  0x19   : > { %s2196_s7 = scalar_select %p1747_p9, 1, 0 }
  0x1a   : > { %p1752_p11 = pnand %p1149_p8, %p156_p10  ;;  %s171_s10 = sshll.u32 %s1627_s9, 4  ;;  %s172_s10 = int_to_ptr.vmem [resolvable:$true] %s171_s10 }
  0x1b   : > { %2197 = sst [smem:[#allocation18_spill]] %s2196_s7  ;;  %s1628_s12 = smov [#allocation11]  }
  0x1c   : > { %s2198_s8 = scalar_select %p1752_p11, 1, 0 }
  0x1d   : > { %p1214_p12 = pneg %p1752_p11  ;;  %s184_s13 = sshll.u32 %s1628_s12, 4  ;;  %s1764_s13 = int_to_ptr.vmem [resolvable:$true] %s184_s13 }
  0x1e   : > { %s2200_s2 = sld [smem:[#allocation20_spill]] }
  0x1f   : > { %p1760_p13 = pnand %p1214_p12, %p1727_p1 }
  0x21   : > { %p1415_p2 = pneg %p1760_p13 }
  0x24   : > { %s1413_s16 = scalar_lea.hbm %s2200_s2, 640 }
  0x25   : > { %p1414_p0 = scmp.ne.s32.totalorder %s2200_s2, %s1413_s16  ;;  %p1420_p6 = scmp.lt.u32.totalorder %s1413_s16, %s2200_s2 }
  0x27   : > { %p1416_p4 = pnand %p1415_p2, %p1414_p0 }
  0x29   : > { %p1417_p5 = pneg %p1416_p4 }
  0x2b   : > { %p1422_p8 = pnand %p1420_p6, %p1417_p5 }
  0x2d   : > { %1425 = shalt.err (!%p1422_p8)
}
  0x2e   : > { %s1426_s12 = scalar_lea.vmem %s172_s10, 640  ;;  %p1434_p7 = scmp.lt.s32.totalorder %s172_s10, %s172_s10 }
  0x2f   : > { %p1427_p10 = scmp.ne.s32.totalorder %s172_s10, %s1426_s12  ;;  %p1435_p1 = scmp.lt.s32.totalorder %s1426_s12, %s1426_s12 }
  0x31   : > { %p1429_p12 = pnand %p1427_p10, %p1415_p2  ;;  %p1436_p3 = por %p1435_p1, %p1434_p7 }
  0x33   : > { %p1430_p9 = pneg %p1429_p12 }
  0x35   : > { %p1437_p11 = pnand %p1436_p3, %p1430_p9 }
  0x37   : > { %1440 = shalt.err (!%p1437_p11)
}
  0x38   : > { %s1629_s14 = smov 64   ;;  %s1630_s15 = smov 4  }
  0x39   : > { %1217 = dma.hbm_to_vmem [thread:$0]  (!%p1760_p13), %s2200_s2, 640, %s172_s10, [#allocation10], %s1629_s14, %s1629_s14, %s1630_s15  }
  0x3a   : > { %s2201_s3 = sld [smem:[#allocation21_spill]] }
  0x40   : > { %s1441_s9 = scalar_lea.hbm %s2201_s3, 1280 }
  0x41   : > { %p1442_p0 = scmp.ne.s32.totalorder %s2201_s3, %s1441_s9  ;;  %p1448_p7 = scmp.lt.u32.totalorder %s1441_s9, %s2201_s3 }
  0x43   : > { %p1444_p1 = pnand %p1442_p0, %p1415_p2 }
  0x45   : > { %p1445_p3 = pneg %p1444_p1 }
  0x47   : > { %p1450_p9 = pnand %p1448_p7, %p1445_p3 }
  0x49   : > { %1453 = shalt.err (!%p1450_p9)
}
  0x4a   : > { %s1454_s10 = scalar_lea.vmem %s1764_s13, 1280  ;;  %p1462_p6 = scmp.lt.s32.totalorder %s1764_s13, %s1764_s13 }
  0x4b   : > { %p1455_p11 = scmp.ne.s32.totalorder %s1764_s13, %s1454_s10  ;;  %p1463_p8 = scmp.lt.s32.totalorder %s1454_s10, %s1454_s10 }
  0x4d   : > { %p1457_p4 = pnand %p1455_p11, %p1415_p2  ;;  %p1464_p10 = por %p1463_p8, %p1462_p6 }
  0x4f   : > { %p1458_p5 = pneg %p1457_p4 }
  0x51   : > { %p1465_p12 = pnand %p1464_p10, %p1458_p5 }
  0x53   : > { %1468 = shalt.err (!%p1465_p12)
}
  0x54   : > { %s1631_s17 = smov 128   ;;  %s1632_s30 = smov 8  }
  0x55   : > { %1220 = dma.hbm_to_vmem [thread:$0]  (!%p1760_p13), %s2201_s3, 1280, %s1764_s13, [#allocation10], %s1631_s17, %s1631_s17, %s1632_s30  }
  0x56   : > { %s31_s15 = sadd.s32 1, %s1617_s24  ;;  %s34_s16 = sadd.s32 1, %s1621_s25 }
  0x57   : > { %p32_p2 = scmp.ge.s32.totalorder %s31_s15, 2  ;;  %s62_s20 = sadd.s32 1, %s1605_s22 }
  0x58   : > { %p69_p0 = scmp.ne.s32.totalorder %s1605_s22, %s1601_s21  ;;  %p70_p1 = scmp.eq.s32.totalorder %s1625_s26, 0 }
  0x59   : > { %s2224_s15 = smov (%p32_p2, %s31_s15), 0  ;;  %s2226_s16 = smov (!%p32_p2, %s34_s16), %s1621_s25 }
  0x5a   : > { %2202 = sst [smem:[#allocation19_spill]] %s2224_s15  ;;  %p1822_p3 = por %p70_p1, %p69_p0 }
  0x5b   : > { %s128_s27 = ssub.s32 %s1617_s24, %s2224_s15  ;;  %p36_p13 = scmp.ge.s32.totalorder %s2226_s16, 2 }
  0x5c   : > { %p1231_p7 = scmp.lt.s32.totalorder %s1625_s26, 4  ;;  %s198_s13 = sand.u32 1, %s1605_s22  }
  0x5d   : > { %s1192_s28 = sshll.u32 %s1621_s25, 11  ;;  %s2228_s16 = smov (%p36_p13, %s2226_s16), 0 }
  0x5e   : > { %s1153_s9 = sshll.u32 %s198_s13, 7  ;;  %s59_s12 = ssub.s32 %s1621_s25, %s2228_s16 }
  0x5f   : > { %p60_p9 = scmp.eq.s32.totalorder %s59_s12, 0  ;;  %s129_s10 = sor.u32 %s128_s27, %s59_s12 }
  0x60   : > { %p130_p11 = scmp.eq.s32.totalorder %s129_s10, 0  ;;  %s1838_s7 = scalar_lea.hbm %s2176_s1, %s1192_s28 }
  0x61   : > { %s1841_s14 = scalar_select %p60_p9, %s1605_s22, %s62_s20  }
  0x62   : > { %s2204_s2 = sadd.s32 1, %s1593_s19  ;;  %s202_s15 = scalar_lea.vmem [#allocation6], %s1153_s9 }
  0x63   : > { %s1846_s3 = scalar_select %p130_p11, %s1593_s19, %s2204_s2  }
  0x64   : > { %s209_s24 = sshll.u32 %s202_s15, 4  ;;  %p1852_p4 = pnand %p1231_p7, %p1822_p3  ;;  %s1856_s24 = int_to_ptr.vmem [resolvable:$true] %s209_s24 }
  0x65   : > { %s1858_s28 = scalar_lea.sflag [#allocation7], %s198_s13  ;;  %s1469_s20 = scalar_lea.hbm %s1838_s7, 2048 }
  0x66   : > { %p1470_p5 = scmp.ne.s32.totalorder %s1838_s7, %s1469_s20  ;;  %p1471_p6 = pneg %p1852_p4 }
  0x67   : > { %s1474_s11 = scalar_lea.hbm %s2176_s1, 4096  ;;  %p1475_p12 = scmp.lt.u32.totalorder %s1838_s7, %s2176_s1 }
  0x68   : > { %p1472_p8 = pnand %p1471_p6, %p1470_p5  ;;  %p1476_p2 = scmp.lt.u32.totalorder %s1474_s11, %s1469_s20 }
  0x69   : > { %p1478_p1 = scmp.lt.u32.totalorder %s1469_s20, %s1838_s7 }
  0x6a   : > { %p1473_p10 = pneg %p1472_p8  ;;  %p1477_p0 = por %p1476_p2, %p1475_p12 }
  0x6c   : > { %p1479_p3 = por %p1478_p1, %p1477_p0 }
  0x6e   : > { %p1480_p13 = pnand %p1479_p3, %p1473_p10 }
  0x70   : > { %1483 = shalt.err (!%p1480_p13)
}
  0x71   : > { %s1484_s13 = scalar_lea.vmem %s1856_s24, 2048  ;;  %s1633_s10 = smov [#allocation6]  }
  0x72   : > { %p1485_p7 = scmp.ne.s32.totalorder %s1856_s24, %s1484_s13  ;;  %s1489_s17 = sshll.u32 %s1633_s10, 4  ;;  %s1490_s17 = int_to_ptr.vmem [resolvable:$false] %s1489_s17 }
  0x73   : > { %s1491_s30 = scalar_lea.vmem %s1490_s17, 4096  ;;  %p1492_p5 = scmp.lt.s32.totalorder %s1856_s24, %s1490_s17 }
  0x74   : > { %p1487_p9 = pnand %p1485_p7, %p1471_p6  ;;  %p1493_p8 = scmp.lt.s32.totalorder %s1491_s30, %s1484_s13 }
  0x76   : > { %p1488_p11 = pneg %p1487_p9  ;;  %p1494_p12 = por %p1493_p8, %p1492_p5 }
  0x78   : > { %p1495_p2 = pnand %p1494_p12, %p1488_p11 }
  0x7a   : > { %1498 = shalt.err (!%p1495_p2)
}
  0x7b   : > { %s1634_s20 = smov 256   ;;  %s1635_s2 = smov 16  }
  0x7c   : > { %1224 = dma.hbm_to_vmem [thread:$0]  (!%p1852_p4), %s1838_s7, 2048, %s1856_s24, %s1858_s28, %s1634_s20, %s1634_s20, %s1635_s2  }
  0x7d   : > { %p2206_p6 = scmp.ne.s32.totalorder %s2198_s8, 0 }
  0x7e   : > { %s223_s15 = sand.u32 (!%p2206_p6), 1, %s1601_s21   ;;  %p2207_p10 = scmp.ne.s32.totalorder (!%p2206_p6), %s2194_s5, 0 }
  0x7f   : > { %221 = sbr.rel (%p2206_p6) target bundleno = 1235 (0x4d3), region = 36  ;;  %s1157_s11 = sshll.u32 (!%p2206_p6), %s223_s15, 7 }
  0x80   : > { %s224_s9 = scalar_lea.sflag (!%p2206_p6), [#allocation7], %s223_s15  ;;  %s1889_s12 = scalar_lea.vmem (!%p2206_p6), [#allocation6], %s1157_s11 }
  0x86   : > { %1572 = dma.done.wait (%p2207_p10), %s224_s9, 2048  }
  0x87   : > { %1574 = vsyncadd (%p2207_p10), %s224_s9, 4294965248  ;;  %p2208_p0 = scmp.ne.s32.totalorder %s2193_s29, 0 }
  0x89   : > { %1576 = dma.done.wait (%p2208_p0), [#allocation10], 1920  }
  0x8a   : > { %1578 = vsyncadd (%p2208_p0), [#allocation10], 4294965376  ;;  %s257_s24 = sand.u32 1, %s1589_s18   ;;  %p1161_p4 = scmp.ne.s32.totalorder %s1609_s23, 0 }
  0x8b   : > { %s1160_s8 = sshll.u32 %s257_s24, 6  ;;  %v267_v0 = vld [vmem:[%s1889_s12 + $0x8] sm:$0xff] (!%p1161_p4)  ;;  %v269_v1 = vld [vmem:[%s1889_s12 + $0x18] sm:$0xff] (!%p1161_p4)  ;;  %v266_v2 = vld [vmem:[%s1889_s12] sm:$0xff] (!%p1161_p4)  ;;  %v1636_v7 = vmov (!%p1161_p4), 0   ;;  %vm385_vm0 = vcmask (!%p1161_p4), 523264  }
  0x8c   : > { %s1902_s7 = scalar_lea.vmem [#allocation12], %s1160_s8  ;;  %265 = sbr.rel (%p1161_p4) target bundleno = 394 (0x18a), region = 52  ;;  %v283_v3 = vpack.c.bf16 (!%p1161_p4), %v269_v1, %v267_v0  ;;  %v268_v4 = vld [vmem:[%s1889_s12 + $0x10] sm:$0xff] (!%p1161_p4)  ;;  %v271_v5 = vld [vmem:[%s1889_s12 + $0x28] sm:$0xff] (!%p1161_p4)  ;;  %v273_v6 = vld [vmem:[%s1889_s12 + $0x38] sm:$0xff] (!%p1161_p4)  ;;  %433 = vmatprep.mubr.bf16.mxu0 (!%p1161_p4), %v1636_v7  ;;  %463 = vmatprep.mubr.bf16.mxu1 (!%p1161_p4), %v1636_v7 }
  0x8d   : > { %v282_v8 = vpack.c.bf16 (!%p1161_p4), %v268_v4, %v266_v2  ;;  %v285_v9 = vpack.c.bf16 (!%p1161_p4), %v273_v6, %v271_v5  ;;  %v270_v10 = vld [vmem:[%s1889_s12 + $0x20] sm:$0xff] (!%p1161_p4)  ;;  %v272_v11 = vld [vmem:[%s1889_s12 + $0x30] sm:$0xff] (!%p1161_p4)  ;;  %v275_v12 = vld [vmem:[%s1889_s12 + $0x48] sm:$0xff] (!%p1161_p4)  ;;  %1339 = vset.pattern.permute.xlu1 (!%p1161_p4), %v1636_v7  ;;  %1338 = vset.pattern.permute.xlu0 (!%p1161_p4), %v1636_v7 }
  0x8e   : > { %401 = vmatprep.subr.bf16.mxu0 (!%p1161_p4), %v283_v3  ;;  %1194 = vmatprep.subr.bf16.mxu1 (!%p1161_p4), %v283_v3  ;;  %v277_v13 = vld [vmem:[%s1889_s12 + $0x58] sm:$0xff] (!%p1161_p4)  ;;  %v284_v14 = vpack.c.bf16 (!%p1161_p4), %v272_v11, %v270_v10  ;;  %v274_v15 = vld [vmem:[%s1889_s12 + $0x40] sm:$0xff] (!%p1161_p4)  ;;  %v276_v16 = vld [vmem:[%s1889_s12 + $0x50] sm:$0xff] (!%p1161_p4) }
  0x8f   : > { %402 = vmatpush1.bf16.msra.mxu0 (!%p1161_p4), %v282_v8  ;;  %1198 = vmatpush1.bf16.msra.mxu1 (!%p1161_p4), %v282_v8  ;;  %v287_v17 = vpack.c.bf16 (!%p1161_p4), %v277_v13, %v275_v12  ;;  %v279_v18 = vld [vmem:[%s1889_s12 + $0x68] sm:$0xff] (!%p1161_p4)  ;;  %v281_v19 = vld [vmem:[%s1889_s12 + $0x78] sm:$0xff] (!%p1161_p4)  ;;  %v286_v20 = vpack.c.bf16 (!%p1161_p4), %v276_v16, %v274_v15  ;;  %v278_v21 = vld [vmem:[%s1889_s12 + $0x60] sm:$0xff] (!%p1161_p4) }
  0x90   : > { %403 = vmatprep.subr.bf16.mxu0 (!%p1161_p4), %v285_v9  ;;  %1195 = vmatprep.subr.bf16.mxu1 (!%p1161_p4), %v285_v9  ;;  %v289_v22 = vpack.c.bf16 (!%p1161_p4), %v281_v19, %v279_v18  ;;  %v280_v23 = vld [vmem:[%s1889_s12 + $0x70] sm:$0xff] (!%p1161_p4)  ;;  %v303_v24 = vld [vmem:[#allocation11 + $0x18] sm:$0xff] (!%p1161_p4)  ;;  %v304_v27 = vld [vmem:[#allocation11 + $0x20] sm:$0xff] (!%p1161_p4) }
  0x91   : > { %v301_v25 = vld [vmem:[#allocation11 + $0x8] sm:$0xff] (!%p1161_p4)  ;;  %327 = vperm.xlu1 (!%p1161_p4), %1339, %v303_v24   ;;  %v288_v26 = vpack.c.bf16 (!%p1161_p4), %v280_v23, %v278_v21  ;;  %v302_v28 = vld [vmem:[#allocation11 + $0x10] sm:$0xff] (!%p1161_p4)  ;;  %v1340_v29 = vld [vmem:[#allocation9] sm:$0xff] (!%p1161_p4)  }
  0x92   : > { %317 = vperm.xlu0 (!%p1161_p4), %1338, %v301_v25   ;;  %v1341_v30 = vld [vmem:[#allocation9 + $0x18] sm:$0xff] (!%p1161_p4)   ;;  %v305_v32 = vld [vmem:[#allocation11 + $0x28] sm:$0xff] (!%p1161_p4)  ;;  %v308_v33 = vld [vmem:[#allocation11 + $0x40] sm:$0xff] (!%p1161_p4) }
  0x93   : > { %404 = vmatpush1.bf16.msra.mxu0 %v284_v14  ;;  %1199 = vmatpush1.bf16.msra.mxu1 %v284_v14  ;;  %v306_v31 = vld [vmem:[#allocation11 + $0x30] sm:$0xff]  ;;  %v307_v34 = vld [vmem:[#allocation11 + $0x38] sm:$0xff]  ;;  %v1342_v35 = vld [vmem:[#allocation9 + $0x8] sm:$0xff]  }
  0x94   : > { %405 = vmatprep.subr.bf16.mxu0 %v287_v17  ;;  %1196 = vmatprep.subr.bf16.mxu1 %v287_v17  ;;  %v1343_v36 = vld [vmem:[#allocation9 + $0x20] sm:$0xff]   ;;  %v300_v37 = vld [vmem:[#allocation11] sm:$0xff]  ;;  %v309_v38 = vld [vmem:[#allocation11 + $0x48] sm:$0xff] }
  0x95   : > { %332 = vperm.xlu1 %1339, %v304_v27   ;;  %v1344_v39 = vld [vmem:[#allocation9 + $0x10] sm:$0xff]  }
  0x96   : > { %322 = vperm.xlu0 %1338, %v302_v28  }
  0x97   : > { %406 = vmatpush1.bf16.msra.mxu0 %v286_v20  ;;  %1200 = vmatpush1.bf16.msra.mxu1 %v286_v20 }
  0x98   : > { %407 = vmatprep.subr.bf16.mxu0 %v289_v22  ;;  %1197 = vmatprep.subr.bf16.mxu1 %v289_v22 }
  0x99   : > { %342 = vperm.xlu1 %1339, %v306_v31  }
  0x9a   : > { %337 = vperm.xlu0 %1338, %v305_v32  }
  0x9b   : > { %408 = vmatpush1.bf16.msra.mxu0 %v288_v26  ;;  %1201 = vmatpush1.bf16.msra.mxu1 %v288_v26 }
  0x9d   : > { %352 = vperm.xlu1 %1339, %v308_v33  }
  0x9e   : > { %1167 = vmatmul.mubr.msk.bf16.vlgmr.msra.gmra.mrb[0].mxu0 %vm385_vm0, %v1340_v29  ;;  %1170 = vmatmul.mubr.msk.bf16.vlgmr.msra.gmra.mrb[0].mxu1 %vm385_vm0, %v1341_v30 }
  0x9f   : > { %443 = vmatprep.mubr.bf16.mxu0 %v1636_v7  ;;  %473 = vmatprep.mubr.bf16.mxu1 %v1636_v7 }
  0xa0   : > { %347 = vperm.xlu0 %1338, %v307_v34  }
  0xa1   : > { %312 = vperm.xlu1 %1339, %v300_v37  }
  0xa4   : > { %357 = vperm.xlu0 %1338, %v309_v38  }
  0xa6   : > { %1168 = vmatmul.mubr.msk.bf16.gmra.mrb[4].mxu0 %vm385_vm0, %v1342_v35  ;;  %1171 = vmatmul.mubr.msk.bf16.gmra.mrb[4].mxu1 %vm385_vm0, %v1343_v36 }
  0xa7   : > { %453 = vmatprep.mubr.bf16.mxu0 %v1636_v7 }
  0xae   : > { %1169 = vmatmul.mubr.msk.bf16.gmra.mrb[8].mxu0 %vm385_vm0, %v1344_v39 }
 0x110   : > { %v328_v40 = vpop.permute.xlu1 %327 }
 0x111   : > { %v318_v42 = vpop.permute.xlu0 %317 }
 0x114   : > { %v1933_v41 = vpop.permute.xlu1 %332 }
 0x115   : > { %v323_v44 = vpop.permute.xlu0 %322 }
 0x118   : > { %v343_v43 = vpop.permute.xlu1 %342 }
 0x119   : > { %v338_v46 = vpop.permute.xlu0 %337 }
 0x11c   : > { %v353_v45 = vpop.permute.xlu1 %352 }
 0x11f   : > { %v348_v48 = vpop.permute.xlu0 %347 }
 0x120   : > { %v313_v47 = vpop.permute.xlu1 %312 }
 0x123   : > { %v358_v4 = vpop.permute.xlu0 %357 }
 0x171   : > { %v435_v49 = vpop.f32.mrb[0].mxu0  ;;  %v465_v50 = vpop.f32.mrb[0].mxu1 }
 0x172   : > { %v436_v51 = vadd.f32 %v435_v49, %v313_v47  ;;  %v466_v52 = vadd.f32 %v465_v50, %v343_v43  ;;  %v437_v53 = vpop.f32.mrb[1].mxu0  ;;  %v467_v54 = vpop.f32.mrb[1].mxu1 }
 0x173   : > { %v438_v55 = vadd.f32 %v437_v53, %v313_v47  ;;  %v468_v56 = vadd.f32 %v467_v54, %v343_v43  ;;  %v439_v57 = vpop.f32.mrb[2].mxu0  ;;  %v469_v58 = vpop.f32.mrb[2].mxu1 }
 0x174   : > { %484 = vst [vmem:[#allocation2] sm:$0xff] %v436_v51  ;;  %v440_v59 = vadd.f32 %v439_v57, %v318_v42  ;;  %v470_v60 = vadd.f32 %v469_v58, %v348_v48  ;;  %v441_v61 = vpop.f32.mrb[3].mxu0  ;;  %v471_v62 = vpop.f32.mrb[3].mxu1 }
 0x175   : > { %485 = vst [vmem:[#allocation2 + $0x8] sm:$0xff] %v438_v55  ;;  %v442_v63 = vadd.f32 %v441_v61, %v318_v42  ;;  %v472_v0 = vadd.f32 %v471_v62, %v348_v48 }
 0x176   : > { %v499_v1 = vpack.c.bf16 %v470_v60, %v466_v52 }
 0x177   : > { %v1193_v2 = vpack.c.bf16 %v442_v63, %v440_v59  ;;  %v500_v3 = vpack.c.bf16 %v472_v0, %v468_v56 }
 0x178   : > { %507 = vst [vmem:[#allocation4 + $0x20] sm:$0xff] %v499_v1 }
 0x179   : > { %494 = vst [vmem:[#allocation3] sm:$0xff] %v1193_v2  ;;  %508 = vst [vmem:[#allocation4 + $0x28] sm:$0xff] %v500_v3  ;;  %v445_v5 = vpop.f32.mrb[4].mxu0  ;;  %v475_v6 = vpop.f32.mrb[4].mxu1 }
 0x17a   : > { %v447_v7 = vpop.f32.mrb[5].mxu0  ;;  %v477_v8 = vpop.f32.mrb[5].mxu1  ;;  %v446_v11 = vadd.f32 %v445_v5, %v323_v44  ;;  %v476_v12 = vadd.f32 %v475_v6, %v353_v45 }
 0x17b   : > { %v449_v9 = vpop.f32.mrb[6].mxu0  ;;  %v479_v10 = vpop.f32.mrb[6].mxu1  ;;  %v448_v17 = vadd.f32 %v447_v7, %v323_v44  ;;  %v478_v18 = vadd.f32 %v477_v8, %v353_v45 }
 0x17c   : > { %v450_v13 = vadd.f32 %v449_v9, %v328_v40  ;;  %v480_v14 = vadd.f32 %v479_v10, %v358_v4  ;;  %v451_v15 = vpop.f32.mrb[7].mxu0  ;;  %v481_v16 = vpop.f32.mrb[7].mxu1 }
 0x17d   : > { %v452_v19 = vadd.f32 %v451_v15, %v328_v40  ;;  %v482_v20 = vadd.f32 %v481_v16, %v358_v4 }
 0x17e   : > { %v495_v21 = vpack.c.bf16 %v450_v13, %v446_v11  ;;  %v501_v22 = vpack.c.bf16 %v480_v14, %v476_v12 }
 0x17f   : > { %v496_v23 = vpack.c.bf16 %v452_v19, %v448_v17  ;;  %v502_v24 = vpack.c.bf16 %v482_v20, %v478_v18 }
 0x180   : > { %503 = vst [vmem:[#allocation4] sm:$0xff] %v495_v21  ;;  %509 = vst [vmem:[#allocation4 + $0x30] sm:$0xff] %v501_v22 }
 0x181   : > { %504 = vst [vmem:[#allocation4 + $0x8] sm:$0xff] %v496_v23  ;;  %510 = vst [vmem:[#allocation4 + $0x38] sm:$0xff] %v502_v24  ;;  %v455_v25 = vpop.f32.mrb[8].mxu0 }
 0x182   : > { %v457_v26 = vpop.f32.mrb[9].mxu0  ;;  %v456_v28 = vadd.f32 %v455_v25, %v1933_v41 }
 0x183   : > { %v459_v27 = vpop.f32.mrb[10].mxu0  ;;  %v458_v31 = vadd.f32 %v457_v26, %v1933_v41 }
 0x184   : > { %v460_v29 = vadd.f32 %v459_v27, %v338_v46  ;;  %v461_v30 = vpop.f32.mrb[11].mxu0 }
 0x185   : > { %v462_v32 = vadd.f32 %v461_v30, %v338_v46 }
 0x186   : > { %v497_v33 = vpack.c.bf16 %v460_v29, %v456_v28 }
 0x187   : > { %v498_v34 = vpack.c.bf16 %v462_v32, %v458_v31 }
 0x188   : > { %505 = vst [vmem:[#allocation4 + $0x10] sm:$0xff] %v497_v33 }
 0x189   : > { %506 = vst [vmem:[#allocation4 + $0x18] sm:$0xff] %v498_v34 }
 0x18a PF: > { %s1173_s29 = sshll.u32 %s1609_s23, 7  ;;  %v557_v36 = vld [vmem:[#allocation3] sm:$0xff]  ;;  %vm588_vm1 = vcmask 1043456   ;;  %v1637_v40 = vmov 0   ;;  %vm563_vm2 = vcmask 64512   ;;  %s981_s13 = sld [smem:[#allocation5]] }
 0x18b   : > { %s1938_s5 = sshra.s32 %s1173_s29, 7  ;;  %v1176_v37 = vcombine.high %v557_v36, %v557_v36  ;;  %v1175_v38 = vcombine.low %v557_v36, %v557_v36  ;;  %627 = vmatprep.mubr.bf16.mxu1 %v1637_v40  ;;  %s1188_s17 = sshll.u32 %s1613_s0, 4 }
 0x18c   : > { %s1174_s27 = sshll.u32 %s1938_s5, 3  ;;  %s1035_s30 = sadd.s32 %s1609_s23, %s1188_s17 }
 0x18d   : > { %s515_s28 = scalar_lea.vmem [#allocation2], %s1174_s27  ;;  %1177 = vmatprep.subr.msk.bf16.mxu1 %vm588_vm1, %v1176_v37  ;;  %v590_v39 = vsel %vm588_vm1, %v1175_v38, 0  ;;  %s2084_s10 = scalar_lea.vmem %s1889_s12, %s1174_s27 [#allocation6] }
 0x18e   : > { %v516_v35 = vld [vmem:[%s515_s28] sm:$0xff]  ;;  %596 = vmatpush1.bf16.msra.mxu1 %v590_v39  ;;  %s1189_s20 = sshll.u32 %s1035_s30, 7  ;;  %s1038_s0 = sshll.u32 %s1902_s7, 4  ;;  %s2108_s0 = int_to_ptr.vmem [resolvable:$true] %s1038_s0 }
 0x18f   : > { %517 = vxpose.xlu0.b32.start.end [1/1] (short) %v516_v35, 128  ;;  %s2106_s11 = scalar_lea.hbm %s2179_s4, %s1189_s20  ;;  %s2114_s23 = scalar_lea.sflag [#allocation8], %s257_s24 }
 0x190   : > { %s1499_s9 = scalar_lea.vmem %s2108_s0, 1024  ;;  %p2209_p3 = scmp.ne.s32.totalorder %s2195_s6, 0 }
 0x191   : > { %p1500_p1 = scmp.ne.s32.totalorder %s2108_s0, %s1499_s9  ;;  %s1639_s12 = smov [#allocation12]  }
 0x192   : > { %s1503_s8 = sshll.u32 %s1639_s12, 4  ;;  %s1504_s8 = int_to_ptr.vmem [resolvable:$false] %s1503_s8 }
 0x193   : > { %p1501_p13 = pnand %p1500_p1, %p2209_p3  ;;  %s1505_s29 = scalar_lea.vmem %s1504_s8, 2048 }
 0x194   : > { %p1506_p9 = scmp.lt.s32.totalorder %s2108_s0, %s1504_s8  ;;  %p1507_p11 = scmp.lt.s32.totalorder %s1505_s29, %s1499_s9 }
 0x195   : > { %p1502_p7 = pneg %p1501_p13 }
 0x196   : > { %p1508_p5 = por %p1507_p11, %p1506_p9 }
 0x198   : > { %p1509_p8 = pnand %p1508_p5, %p1502_p7 }
 0x20f   : > { %v533_v41 = vpop.trf.xlu0 }
 0x213   : > { %v534_v42 = vpop.trf.xlu0 }
 0x214   : > { %v549_v43 = vpack.c.bf16 %v534_v42, %v533_v41 }
 0x216   : > { %1178 = vmatmul.mubr.msk.bf16.vlgmr.msra.gmra.mrb[0].mxu1 %vm563_vm2, %v549_v43 }
 0x217   : > { %v535_v44 = vpop.trf.xlu0  ;;  %637 = vmatprep.mubr.bf16.mxu1 %v1637_v40 }
 0x21b   : > { %v536_v45 = vpop.trf.xlu0 }
 0x21c   : > { %v550_v46 = vpack.c.bf16 %v536_v45, %v535_v44 }
 0x21e   : > { %1179 = vmatmul.mubr.msk.bf16.gmra.mrb[4].mxu1 %vm563_vm2, %v550_v46 }
 0x21f   : > { %v537_v47 = vpop.trf.xlu0  ;;  %647 = vmatprep.mubr.bf16.mxu1 %v1637_v40 }
 0x223   : > { %v538_v48 = vpop.trf.xlu0 }
 0x224   : > { %v551_v49 = vpack.c.bf16 %v538_v48, %v537_v47 }
 0x226   : > { %1180 = vmatmul.mubr.msk.bf16.gmra.mrb[8].mxu1 %vm563_vm2, %v551_v49  ;;  %v909_v49 = vld [vmem:[#allocation4 + $0x8] sm:$0xff] }
 0x227   : > { %v539_v50 = vpop.trf.xlu0  ;;  %657 = vmatprep.mubr.bf16.mxu1 %v1637_v40  ;;  %948 = vmatprep.mubr.bf16.mxu0 %v909_v49 }
 0x22b   : > { %v540_v51 = vpop.trf.xlu0 }
 0x22c   : > { %v552_v52 = vpack.c.bf16 %v540_v51, %v539_v50  ;;  %v1638_v50 = vmov 1065369472  }
 0x22e   : > { %1181 = vmatmul.mubr.msk.bf16.gmra.mrb[12].mxu1 %vm563_vm2, %v552_v52 }
 0x22f   : > { %v541_v53 = vpop.trf.xlu0  ;;  %667 = vmatprep.mubr.bf16.mxu1 %v1637_v40 }
 0x233   : > { %v542_v54 = vpop.trf.xlu0 }
 0x234   : > { %v553_v55 = vpack.c.bf16 %v542_v54, %v541_v53 }
 0x236   : > { %1182 = vmatmul.mubr.msk.bf16.gmra.mrb[16].mxu1 %vm563_vm2, %v553_v55 }
 0x237   : > { %v543_v56 = vpop.trf.xlu0  ;;  %677 = vmatprep.mubr.bf16.mxu1 %v1637_v40 }
 0x23b   : > { %v544_v57 = vpop.trf.xlu0 }
 0x23c   : > { %v554_v58 = vpack.c.bf16 %v544_v57, %v543_v56 }
 0x23e   : > { %1183 = vmatmul.mubr.msk.bf16.gmra.mrb[20].mxu1 %vm563_vm2, %v554_v58 }
 0x23f   : > { %v545_v59 = vpop.trf.xlu0  ;;  %687 = vmatprep.mubr.bf16.mxu1 %v1637_v40 }
 0x243   : > { %v546_v60 = vpop.trf.xlu0 }
 0x244   : > { %v555_v61 = vpack.c.bf16 %v546_v60, %v545_v59 }
 0x246   : > { %1184 = vmatmul.mubr.msk.bf16.gmra.mrb[24].mxu1 %vm563_vm2, %v555_v61 }
 0x247   : > { %v547_v62 = vpop.trf.xlu0  ;;  %697 = vmatprep.mubr.bf16.mxu1 %v1637_v40 }
 0x24b   : > { %v548_v63 = vpop.trf.xlu0 }
 0x24c   : > { %v556_v0 = vpack.c.bf16 %v548_v63, %v547_v62 }
 0x24e   : > { %1185 = vmatmul.mubr.msk.bf16.gmra.mrb[28].mxu1 %vm563_vm2, %v556_v0 }
 0x24f   : > { %900 = vmatprep.mubr.bf16.mxu1 %v1638_v50 }
 0x2e9   : > { %v1951_v1 = vpop.f32.mrb[0].mxu1 }
 0x2ea   : > { %v1953_v2 = vpop.f32.mrb[1].mxu1 }
 0x2eb   : > { %v1955_v3 = vpop.f32.mrb[2].mxu1  ;;  %v708_v4 = vmax.f32 %v1951_v1, %v1953_v2 }
 0x2ec   : > { %v1959_v5 = vpop.f32.mrb[3].mxu1 }
 0x2ed   : > { %709 = vmax.xlane.f32.xlu0 %v708_v4  ;;  %v711_v6 = vmax.f32 %v1955_v3, %v1959_v5 }
 0x2ef   : > { %712 = vmax.xlane.f32.xlu1 %v711_v6 }
 0x2f1   : > { %v1963_v7 = vpop.f32.mrb[4].mxu1 }
 0x2f2   : > { %v1965_v8 = vpop.f32.mrb[5].mxu1 }
 0x2f3   : > { %v1967_v9 = vpop.f32.mrb[6].mxu1  ;;  %v714_v10 = vmax.f32 %v1963_v7, %v1965_v8 }
 0x2f4   : > { %v1971_v11 = vpop.f32.mrb[7].mxu1 }
 0x2f5   : > { %715 = vmax.xlane.f32.xlu1 %v714_v10  ;;  %v717_v12 = vmax.f32 %v1967_v9, %v1971_v11 }
 0x2f9   : > { %718 = vmax.xlane.f32.xlu1 %v717_v12  ;;  %v1975_v13 = vpop.f32.mrb[8].mxu1 }
 0x2fa   : > { %v1977_v14 = vpop.f32.mrb[9].mxu1 }
 0x2fb   : > { %v1979_v15 = vpop.f32.mrb[10].mxu1  ;;  %v720_v16 = vmax.f32 %v1975_v13, %v1977_v14 }
 0x2fc   : > { %v1983_v17 = vpop.f32.mrb[11].mxu1 }
 0x2fd   : > { %721 = vmax.xlane.f32.xlu1 %v720_v16  ;;  %v723_v18 = vmax.f32 %v1979_v15, %v1983_v17 }
 0x301   : > { %724 = vmax.xlane.f32.xlu1 %v723_v18  ;;  %v1987_v19 = vpop.f32.mrb[12].mxu1 }
 0x302   : > { %v1989_v20 = vpop.f32.mrb[13].mxu1 }
 0x303   : > { %v1991_v21 = vpop.f32.mrb[14].mxu1  ;;  %v726_v22 = vmax.f32 %v1987_v19, %v1989_v20 }
 0x304   : > { %v1995_v23 = vpop.f32.mrb[15].mxu1 }
 0x305   : > { %727 = vmax.xlane.f32.xlu1 %v726_v22  ;;  %v729_v24 = vmax.f32 %v1991_v21, %v1995_v23 }
 0x309   : > { %730 = vmax.xlane.f32.xlu1 %v729_v24  ;;  %v1999_v25 = vpop.f32.mrb[16].mxu1 }
 0x30a   : > { %v2001_v26 = vpop.f32.mrb[17].mxu1 }
 0x30b   : > { %v2003_v27 = vpop.f32.mrb[18].mxu1  ;;  %v732_v28 = vmax.f32 %v1999_v25, %v2001_v26 }
 0x30c   : > { %v2007_v29 = vpop.f32.mrb[19].mxu1 }
 0x30d   : > { %733 = vmax.xlane.f32.xlu1 %v732_v28  ;;  %v735_v30 = vmax.f32 %v2003_v27, %v2007_v29 }
 0x311   : > { %736 = vmax.xlane.f32.xlu1 %v735_v30  ;;  %v2011_v31 = vpop.f32.mrb[20].mxu1 }
 0x312   : > { %v2013_v32 = vpop.f32.mrb[21].mxu1 }
 0x313   : > { %v2015_v33 = vpop.f32.mrb[22].mxu1  ;;  %v738_v34 = vmax.f32 %v2011_v31, %v2013_v32 }
 0x314   : > { %v2019_v35 = vpop.f32.mrb[23].mxu1 }
 0x315   : > { %739 = vmax.xlane.f32.xlu1 %v738_v34  ;;  %v741_v36 = vmax.f32 %v2015_v33, %v2019_v35 }
 0x319   : > { %742 = vmax.xlane.f32.xlu1 %v741_v36  ;;  %v2023_v37 = vpop.f32.mrb[24].mxu1 }
 0x31a   : > { %v2025_v38 = vpop.f32.mrb[25].mxu1 }
 0x31b   : > { %v2027_v39 = vpop.f32.mrb[26].mxu1  ;;  %v744_v40 = vmax.f32 %v2023_v37, %v2025_v38 }
 0x31c   : > { %v2031_v41 = vpop.f32.mrb[27].mxu1 }
 0x31d   : > { %745 = vmax.xlane.f32.xlu1 %v744_v40  ;;  %v747_v42 = vmax.f32 %v2027_v39, %v2031_v41 }
 0x321   : > { %748 = vmax.xlane.f32.xlu1 %v747_v42  ;;  %v2035_v43 = vpop.f32.mrb[28].mxu1 }
 0x322   : > { %v2037_v44 = vpop.f32.mrb[29].mxu1 }
 0x323   : > { %v2039_v45 = vpop.f32.mrb[30].mxu1  ;;  %v750_v46 = vmax.f32 %v2035_v43, %v2037_v44 }
 0x324   : > { %v2043_v47 = vpop.f32.mrb[31].mxu1 }
 0x325   : > { %751 = vmax.xlane.f32.xlu1 %v750_v46  ;;  %v753_v48 = vmax.f32 %v2039_v45, %v2043_v47 }
 0x329   : > { %754 = vmax.xlane.f32.xlu1 %v753_v48 }
 0x37a   : > { %v710_v51 = vpop.xlane.xlu0 %709 }
 0x37b   : > { %v756_v52 = vsub.f32 %v1951_v1, %v710_v51  ;;  %v757_v53 = vsub.f32 %v1953_v2, %v710_v51 }
 0x37c   : > { %v713_v54 = vpop.xlane.xlu1 %712 }
 0x37d   : > { %v788_v55 = vmul.f32 1.442695, %v756_v52  ;;  %v790_v56 = vmul.f32 1.442695, %v757_v53  ;;  %v758_v57 = vsub.f32 %v1955_v3, %v713_v54  ;;  %v759_v58 = vsub.f32 %v1959_v5, %v713_v54 }
 0x37f   : > { %1347 = vpow2.f32 %v788_v55  ;;  %v792_v59 = vmul.f32 1.442695, %v758_v57  ;;  %v794_v60 = vmul.f32 1.442695, %v759_v58 }
 0x380   : > { %1349 = vpow2.f32 %v790_v56 }
 0x381   : > { %1351 = vpow2.f32 %v792_v59 }
 0x382   : > { %1353 = vpow2.f32 %v794_v60  ;;  %v716_v61 = vpop.xlane.xlu1 %715 }
 0x383   : > { %v760_v62 = vsub.f32 %v1963_v7, %v716_v61  ;;  %v761_v63 = vsub.f32 %v1965_v8, %v716_v61 }
 0x385   : > { %v796_v0 = vmul.f32 1.442695, %v760_v62  ;;  %v798_v1 = vmul.f32 1.442695, %v761_v63 }
 0x386   : > { %v719_v2 = vpop.xlane.xlu1 %718 }
 0x387   : > { %v762_v4 = vsub.f32 %v1967_v9, %v719_v2  ;;  %v763_v3 = vsub.f32 %v1971_v11, %v719_v2  ;;  %1355 = vpow2.f32 %v796_v0 }
 0x388   : > { %1357 = vpow2.f32 %v798_v1 }
 0x389   : > { %v1348_v6 = vpop.eup %1347  ;;  %v800_v5 = vmul.f32 1.442695, %v762_v4  ;;  %v802_v10 = vmul.f32 1.442695, %v763_v3 }
 0x38a   : > { %v1350_v12 = vpop.eup %1349  ;;  %v722_v16 = vpop.xlane.xlu1 %721 }
 0x38b   : > { %v1352_v18 = vpop.eup %1351  ;;  %1359 = vpow2.f32 %v800_v5  ;;  %v764_v7 = vsub.f32 %v1975_v13, %v722_v16  ;;  %v765_v8 = vsub.f32 %v1977_v14, %v722_v16 }
 0x38c   : > { %v1354_v22 = vpop.eup %1353  ;;  %1361 = vpow2.f32 %v802_v10  ;;  %v852_v24 = vpack.c.bf16 %v1352_v18, %v1348_v6 }
 0x38d   : > { %v804_v28 = vmul.f32 1.442695, %v764_v7  ;;  %v853_v9 = vpack.c.bf16 %v1354_v22, %v1350_v12  ;;  %v806_v30 = vmul.f32 1.442695, %v765_v8 }
 0x38e   : > { %v725_v11 = vpop.xlane.xlu1 %724 }
 0x38f   : > { %v766_v34 = vsub.f32 %v1979_v15, %v725_v11  ;;  %v767_v36 = vsub.f32 %v1983_v17, %v725_v11  ;;  %868 = vmatprep.subr.bf16.mxu1 %v853_v9  ;;  %916 = vmatprep.subr.bf16.mxu0 %v853_v9  ;;  %1363 = vpow2.f32 %v804_v28 }
 0x390   : > { %869 = vmatpush1.bf16.xpose.msra.mxu1 %v852_v24  ;;  %917 = vmatpush1.bf16.xpose.msra.mxu0 %v852_v24  ;;  %1365 = vpow2.f32 %v806_v30 }
 0x391   : > { %v808_v40 = vmul.f32 1.442695, %v766_v34  ;;  %v810_v13 = vmul.f32 1.442695, %v767_v36  ;;  %v1356_v42 = vpop.eup %1355 }
 0x392   : > { %v728_v14 = vpop.xlane.xlu1 %727  ;;  %v1358_v49 = vpop.eup %1357 }
 0x393   : > { %1367 = vpow2.f32 %v808_v40  ;;  %v768_v46 = vsub.f32 %v1987_v19, %v728_v14  ;;  %v769_v48 = vsub.f32 %v1989_v20, %v728_v14 }
 0x394   : > { %1369 = vpow2.f32 %v810_v13 }
 0x395   : > { %v1360_v15 = vpop.eup %1359  ;;  %v812_v51 = vmul.f32 1.442695, %v768_v46  ;;  %v814_v52 = vmul.f32 1.442695, %v769_v48 }
 0x396   : > { %v1362_v17 = vpop.eup %1361  ;;  %v731_v53 = vpop.xlane.xlu1 %730  ;;  %v854_v54 = vpack.c.bf16 %v1360_v15, %v1356_v42 }
 0x397   : > { %v770_v55 = vsub.f32 %v1991_v21, %v731_v53  ;;  %v771_v56 = vsub.f32 %v1995_v23, %v731_v53  ;;  %v855_v57 = vpack.c.bf16 %v1362_v17, %v1358_v49  ;;  %1371 = vpow2.f32 %v812_v51 }
 0x398   : > { %1373 = vpow2.f32 %v814_v52 }
 0x399   : > { %v816_v58 = vmul.f32 1.442695, %v770_v55  ;;  %v818_v59 = vmul.f32 1.442695, %v771_v56  ;;  %870 = vmatprep.subr.bf16.mxu1 %v855_v57  ;;  %918 = vmatprep.subr.bf16.mxu0 %v855_v57  ;;  %v1364_v20 = vpop.eup %1363 }
 0x39a   : > { %871 = vmatpush1.bf16.xpose.msra.mxu1 %v854_v54  ;;  %919 = vmatpush1.bf16.xpose.msra.mxu0 %v854_v54  ;;  %v734_v19 = vpop.xlane.xlu1 %733  ;;  %v1366_v62 = vpop.eup %1365 }
 0x39b   : > { %1375 = vpow2.f32 %v816_v58  ;;  %v772_v60 = vsub.f32 %v1999_v25, %v734_v19  ;;  %v773_v61 = vsub.f32 %v2001_v26, %v734_v19 }
 0x39c   : > { %1377 = vpow2.f32 %v818_v59 }
 0x39d   : > { %v1368_v21 = vpop.eup %1367  ;;  %v820_v23 = vmul.f32 1.442695, %v772_v60  ;;  %v822_v0 = vmul.f32 1.442695, %v773_v61 }
 0x39e   : > { %v1370_v63 = vpop.eup %1369  ;;  %v737_v1 = vpop.xlane.xlu1 %736  ;;  %v856_v2 = vpack.c.bf16 %v1368_v21, %v1364_v20 }
 0x39f   : > { %v774_v4 = vsub.f32 %v2003_v27, %v737_v1  ;;  %v775_v3 = vsub.f32 %v2007_v29, %v737_v1  ;;  %v857_v6 = vpack.c.bf16 %v1370_v63, %v1366_v62  ;;  %1379 = vpow2.f32 %v820_v23 }
 0x3a0   : > { %1381 = vpow2.f32 %v822_v0 }
 0x3a1   : > { %v824_v5 = vmul.f32 1.442695, %v774_v4  ;;  %v826_v10 = vmul.f32 1.442695, %v775_v3  ;;  %872 = vmatprep.subr.bf16.mxu1 %v857_v6  ;;  %920 = vmatprep.subr.bf16.mxu0 %v857_v6  ;;  %v1372_v26 = vpop.eup %1371  ;;  %v908_v6 = vld [vmem:[#allocation4] sm:$0xff] }
 0x3a2   : > { %873 = vmatpush1.bf16.xpose.msra.mxu1 %v856_v2  ;;  %921 = vmatpush1.bf16.xpose.msra.mxu0 %v856_v2  ;;  %v740_v25 = vpop.xlane.xlu1 %739  ;;  %v1374_v18 = vpop.eup %1373 }
 0x3a3   : > { %1383 = vpow2.f32 %v824_v5  ;;  %v776_v12 = vsub.f32 %v2011_v31, %v740_v25  ;;  %v777_v16 = vsub.f32 %v2013_v32, %v740_v25  ;;  %v911_v5 = vld [vmem:[#allocation4 + $0x18] sm:$0xff]  ;;  %v913_v25 = vld [vmem:[#allocation4 + $0x28] sm:$0xff] }
 0x3a4   : > { %1385 = vpow2.f32 %v826_v10  ;;  %v910_v10 = vld [vmem:[#allocation4 + $0x10] sm:$0xff] }
 0x3a5   : > { %v1376_v27 = vpop.eup %1375  ;;  %v828_v29 = vmul.f32 1.442695, %v776_v12  ;;  %v830_v8 = vmul.f32 1.442695, %v777_v16  ;;  %v915_v12 = vld [vmem:[#allocation4 + $0x38] sm:$0xff]  ;;  %v914_v16 = vld [vmem:[#allocation4 + $0x30] sm:$0xff] }
 0x3a6   : > { %v1378_v7 = vpop.eup %1377  ;;  %v743_v22 = vpop.xlane.xlu1 %742  ;;  %v858_v24 = vpack.c.bf16 %v1376_v27, %v1372_v26  ;;  %v912_v26 = vld [vmem:[#allocation4 + $0x20] sm:$0xff] }
 0x3a7   : > { %v778_v28 = vsub.f32 %v2015_v33, %v743_v22  ;;  %v779_v9 = vsub.f32 %v2019_v35, %v743_v22  ;;  %v859_v30 = vpack.c.bf16 %v1378_v7, %v1374_v18  ;;  %1387 = vpow2.f32 %v828_v29 }
 0x3a8   : > { %1389 = vpow2.f32 %v830_v8  ;;  %v995_v7 = vlaneseq }
 0x3a9   : > { %v832_v11 = vmul.f32 1.442695, %v778_v28  ;;  %v834_v34 = vmul.f32 1.442695, %v779_v9  ;;  %874 = vmatprep.subr.bf16.mxu1 %v859_v30  ;;  %922 = vmatprep.subr.bf16.mxu0 %v859_v30  ;;  %v1380_v32 = vpop.eup %1379 }
 0x3aa   : > { %875 = vmatpush1.bf16.xpose.msra.mxu1 %v858_v24  ;;  %923 = vmatpush1.bf16.xpose.msra.mxu0 %v858_v24  ;;  %v746_v31 = vpop.xlane.xlu1 %745  ;;  %v1382_v13 = vpop.eup %1381  ;;  %v996_v9 = vshrl.u32 %v995_v7, 7 }
 0x3ab   : > { %1391 = vpow2.f32 %v832_v11  ;;  %v780_v36 = vsub.f32 %v2023_v37, %v746_v31  ;;  %v781_v40 = vsub.f32 %v2025_v38, %v746_v31  ;;  %v983_v11 = vstv %s981_s13 }
 0x3ac   : > { %1393 = vpow2.f32 %v834_v34  ;;  %v997_v31 = vsub.s32 0, %v996_v9 }
 0x3ad   : > { %v1384_v33 = vpop.eup %1383  ;;  %v836_v35 = vmul.f32 1.442695, %v780_v36  ;;  %v838_v42 = vmul.f32 1.442695, %v781_v40 }
 0x3ae   : > { %v1386_v14 = vpop.eup %1385  ;;  %v749_v46 = vpop.xlane.xlu1 %748  ;;  %v860_v48 = vpack.c.bf16 %v1384_v33, %v1380_v32 }
 0x3af   : > { %v782_v49 = vsub.f32 %v2027_v39, %v749_v46  ;;  %v783_v15 = vsub.f32 %v2031_v41, %v749_v46  ;;  %v861_v51 = vpack.c.bf16 %v1386_v14, %v1382_v13  ;;  %1395 = vpow2.f32 %v836_v35  ;;  %v987_v35 = vld [vmem:[%s2084_s10] sm:$0xff]  ;;  %v988_v14 = vld [vmem:[%s2084_s10 + $0x10] sm:$0xff] }
 0x3b0   : > { %1397 = vpow2.f32 %v838_v42  ;;  %v989_v42 = vld [vmem:[%s2084_s10 + $0x20] sm:$0xff]  ;;  %v990_v46 = vld [vmem:[%s2084_s10 + $0x30] sm:$0xff] }
 0x3b1   : > { %v840_v17 = vmul.f32 1.442695, %v782_v49  ;;  %v842_v52 = vmul.f32 1.442695, %v783_v15  ;;  %876 = vmatprep.subr.bf16.mxu1 %v861_v51  ;;  %924 = vmatprep.subr.bf16.mxu0 %v861_v51  ;;  %v1388_v38 = vpop.eup %1387 }
 0x3b2   : > { %877 = vmatpush1.bf16.xpose.msra.mxu1 %v860_v48  ;;  %925 = vmatpush1.bf16.xpose.msra.mxu0 %v860_v48  ;;  %v752_v37 = vpop.xlane.xlu1 %751  ;;  %v1390_v55 = vpop.eup %1389 }
 0x3b3   : > { %1399 = vpow2.f32 %v840_v17  ;;  %v784_v53 = vsub.f32 %v2035_v43, %v752_v37  ;;  %v785_v54 = vsub.f32 %v2037_v44, %v752_v37 }
 0x3b4   : > { %1401 = vpow2.f32 %v842_v52  ;;  %v991_v52 = vld [vmem:[%s2084_s10 + $0x40] sm:$0xff] }
 0x3b5   : > { %v1392_v39 = vpop.eup %1391  ;;  %v844_v41 = vmul.f32 1.442695, %v784_v53  ;;  %v846_v57 = vmul.f32 1.442695, %v785_v54 }
 0x3b6   : > { %v1394_v56 = vpop.eup %1393  ;;  %v755_v58 = vpop.xlane.xlu1 %754  ;;  %v862_v59 = vpack.c.bf16 %v1392_v39, %v1388_v38 }
 0x3b7   : > { %v786_v19 = vsub.f32 %v2039_v45, %v755_v58  ;;  %v787_v20 = vsub.f32 %v2043_v47, %v755_v58  ;;  %v863_v60 = vpack.c.bf16 %v1394_v56, %v1390_v55  ;;  %1403 = vpow2.f32 %v844_v41  ;;  %v992_v56 = vld [vmem:[%s2084_s10 + $0x50] sm:$0xff] }
 0x3b8   : > { %1405 = vpow2.f32 %v846_v57 }
 0x3b9   : > { %v848_v61 = vmul.f32 1.442695, %v786_v19  ;;  %v850_v62 = vmul.f32 1.442695, %v787_v20  ;;  %878 = vmatprep.subr.bf16.mxu1 %v863_v60  ;;  %926 = vmatprep.subr.bf16.mxu0 %v863_v60  ;;  %v1396_v43 = vpop.eup %1395  ;;  %v993_v60 = vld [vmem:[%s2084_s10 + $0x60] sm:$0xff] }
 0x3ba   : > { %879 = vmatpush1.bf16.xpose.msra.mxu1 %v862_v59  ;;  %927 = vmatpush1.bf16.xpose.msra.mxu0 %v862_v59  ;;  %v1398_v44 = vpop.eup %1397 }
 0x3bb   : > { %1407 = vpow2.f32 %v848_v61 }
 0x3bc   : > { %1409 = vpow2.f32 %v850_v62 }
 0x3bd   : > { %v1400_v21 = vpop.eup %1399 }
 0x3be   : > { %v1402_v23 = vpop.eup %1401  ;;  %v864_v63 = vpack.c.bf16 %v1400_v21, %v1396_v43 }
 0x3bf   : > { %v865_v0 = vpack.c.bf16 %v1402_v23, %v1398_v44  ;;  %v994_v44 = vld [vmem:[%s2084_s10 + $0x70] sm:$0xff] }
 0x3c1   : > { %880 = vmatprep.subr.bf16.mxu1 %v865_v0  ;;  %928 = vmatprep.subr.bf16.mxu0 %v865_v0  ;;  %v1404_v45 = vpop.eup %1403 }
 0x3c2   : > { %881 = vmatpush1.bf16.xpose.msra.mxu1 %v864_v63  ;;  %929 = vmatpush1.bf16.xpose.msra.mxu0 %v864_v63  ;;  %v1406_v47 = vpop.eup %1405 }
 0x3c5   : > { %v1408_v1 = vpop.eup %1407 }
 0x3c6   : > { %v1410_v2 = vpop.eup %1409  ;;  %v866_v4 = vpack.c.bf16 %v1408_v1, %v1404_v45 }
 0x3c7   : > { %v867_v3 = vpack.c.bf16 %v1410_v2, %v1406_v47 }
 0x3c9   : > { %882 = vmatprep.subr.bf16.mxu1 %v867_v3  ;;  %930 = vmatprep.subr.bf16.mxu0 %v867_v3 }
 0x3ca   : > { %883 = vmatpush1.bf16.xpose.msra.mxu1 %v866_v4  ;;  %931 = vmatpush1.bf16.xpose.msra.mxu0 %v866_v4 }
 0x3d1   : > { %901 = vmatmul.mubr.bf16.vlgmr.msra.gmra.mrb[32].mxu1 %v1638_v50  ;;  %949 = vmatmul.mubr.bf16.vlgmr.msra.gmra.mrb[0].mxu0 %v908_v6 }
 0x3d2   : > { %956 = vmatprep.mubr.bf16.mxu0 %v911_v5 }
 0x3d9   : > { %957 = vmatmul.mubr.bf16.gmra.mrb[4].mxu0 %v910_v10 }
 0x3da   : > { %964 = vmatprep.mubr.bf16.mxu0 %v913_v25 }
 0x3e1   : > { %965 = vmatmul.mubr.bf16.gmra.mrb[8].mxu0 %v912_v26 }
 0x3e2   : > { %972 = vmatprep.mubr.bf16.mxu0 %v915_v12 }
 0x3e9   : > { %973 = vmatmul.mubr.bf16.gmra.mrb[12].mxu0 %v914_v16 }
 0x4a4   : > { %v902_v18 = vpop.f32.mrb[32].mxu1  ;;  %v950_v27 = vpop.f32.mrb[0].mxu0 }
 0x4a5   : > { %1411 = vrcp.f32 %v902_v18  ;;  %v952_v29 = vpop.f32.mrb[1].mxu0  ;;  %v904_v50 = vpop.f32.mrb[33].mxu1 }
 0x4a6   : > { %v953_v8 = vpop.f32.mrb[2].mxu0  ;;  %v905_v22 = vpop.f32.mrb[34].mxu1 }
 0x4a7   : > { %v955_v24 = vpop.f32.mrb[3].mxu0  ;;  %v906_v28 = vpop.f32.mrb[35].mxu1 }
 0x4ac   : > { %v958_v30 = vpop.f32.mrb[4].mxu0 }
 0x4ad   : > { %v960_v34 = vpop.f32.mrb[5].mxu0 }
 0x4ae   : > { %v961_v32 = vpop.f32.mrb[6].mxu0 }
 0x4af   : > { %v1412_v36 = vpop.eup %1411  ;;  %v963_v40 = vpop.f32.mrb[7].mxu0 }
 0x4b0   : > { %v984_v13 = vmul.f32 %v1412_v36, %v983_v11 }
 0x4b2   : > { %v998_v33 = vrot.slane %v984_v13, %v997_v31 }
 0x4b4   : > { %v999_v48 = vmul.f32 %v998_v33, %v950_v27  ;;  %v1000_v49 = vmul.f32 %v998_v33, %v953_v8  ;;  %v1001_v15 = vmul.f32 %v998_v33, %v958_v30  ;;  %v1002_v51 = vmul.f32 %v998_v33, %v961_v32  ;;  %v966_v17 = vpop.f32.mrb[8].mxu0 }
 0x4b5   : > { %v1003_v37 = vmul.f32 %v998_v33, %v966_v17  ;;  %v968_v38 = vpop.f32.mrb[9].mxu0 }
 0x4b6   : > { %v1007_v53 = vadd.f32 %v999_v48, %v987_v35  ;;  %v1008_v54 = vadd.f32 %v1000_v49, %v988_v14  ;;  %v1009_v55 = vadd.f32 %v1001_v15, %v989_v42  ;;  %v1010_v39 = vadd.f32 %v1002_v51, %v990_v46  ;;  %v969_v41 = vpop.f32.mrb[10].mxu0 }
 0x4b7   : > { %v1011_v57 = vadd.f32 %v1003_v37, %v991_v52  ;;  %v1004_v58 = vmul.f32 %v998_v33, %v969_v41  ;;  %v971_v59 = vpop.f32.mrb[11].mxu0 }
 0x4b8   : > { %1015 = vst [vmem:[%s1902_s7] sm:$0xff] %v1007_v53  ;;  %1016 = vst [vmem:[%s1902_s7 + $0x8] sm:$0xff] %v1008_v54 }
 0x4b9   : > { %1017 = vst [vmem:[%s1902_s7 + $0x10] sm:$0xff] %v1009_v55  ;;  %1018 = vst [vmem:[%s1902_s7 + $0x18] sm:$0xff] %v1010_v39  ;;  %v1012_v19 = vadd.f32 %v1004_v58, %v992_v56 }
 0x4ba   : > { %1019 = vst [vmem:[%s1902_s7 + $0x20] sm:$0xff] %v1011_v57 }
 0x4bb   : > { %1020 = vst [vmem:[%s1902_s7 + $0x28] sm:$0xff] %v1012_v19 }
 0x4bc   : > { %v974_v20 = vpop.f32.mrb[12].mxu0 }
 0x4bd   : > { %v1005_v61 = vmul.f32 %v998_v33, %v974_v20  ;;  %v976_v62 = vpop.f32.mrb[13].mxu0 }
 0x4be   : > { %v977_v43 = vpop.f32.mrb[14].mxu0 }
 0x4bf   : > { %v1013_v21 = vadd.f32 %v1005_v61, %v993_v60  ;;  %v1006_v23 = vmul.f32 %v998_v33, %v977_v43  ;;  %v979_v63 = vpop.f32.mrb[15].mxu0 }
 0x4c1   : > { %1021 = vst [vmem:[%s1902_s7 + $0x30] sm:$0xff] %v1013_v21  ;;  %v1014_v0 = vadd.f32 %v1006_v23, %v994_v44 }
 0x4c3   : > { %1022 = vst [vmem:[%s1902_s7 + $0x38] sm:$0xff] %v1014_v0 }
 0x4c4   : > { %1512 = shalt.err (!%p1509_p8)
}
 0x4c5   : > { %s1513_s24 = scalar_lea.hbm %s2106_s11, 1024  ;;  %s1517_s27 = scalar_lea.hbm %s2179_s4, 4096 }
 0x4c6   : > { %p1514_p12 = scmp.ne.s32.totalorder %s2106_s11, %s1513_s24  ;;  %p1518_p10 = scmp.lt.u32.totalorder %s2106_s11, %s2179_s4 }
 0x4c7   : > { %p1519_p0 = scmp.lt.u32.totalorder %s1517_s27, %s1513_s24  ;;  %p1521_p1 = scmp.lt.u32.totalorder %s1513_s24, %s2106_s11 }
 0x4c8   : > { %p1515_p2 = pnand %p1514_p12, %p2209_p3 }
 0x4c9   : > { %p1520_p4 = por %p1519_p0, %p1518_p10 }
 0x4ca   : > { %p1516_p6 = pneg %p1515_p2 }
 0x4cb   : > { %p1522_p13 = por %p1521_p1, %p1520_p4 }
 0x4cd   : > { %p1523_p7 = pnand %p1522_p13, %p1516_p6 }
 0x4cf   : > { %1526 = shalt.err (!%p1523_p7)
}
 0x4d0   : > { %s1640_s10 = smov 128   ;;  %s1641_s17 = smov 256  }
 0x4d1   : > { %s1642_s30 = smov 8  }
 0x4d2   : > { %1212 = dma.vmem_to_hbm [thread:$0]  (%p2209_p3), %s2108_s0, 1024, %s2106_s11, %s2114_s23, %s1640_s10, %s1641_s17, %s1642_s30  }
 0x4d3 PF: > { %s2210_s20 = sld [smem:[#allocation16_spill]]  ;;  %s2211_s2 = sld [smem:[#allocation18_spill]] }
 0x4d4   : > { %p1234_p9 = scmp.ge.s32.totalorder %s1625_s26, 2 }
 0x4d9   : > { %s1053_s15 = sand.u32 1, %s2210_s20   ;;  %p2212_p11 = scmp.ne.s32.totalorder %s2211_s2, 0 }
 0x4da   : > { %s1054_s9 = scalar_lea.sflag [#allocation8], %s1053_s15 }
 0x4db   : > { %p1226_p5 = pnand %p1234_p9, %p2212_p11 }
 0x4dd   : > { %1580 = dma.done.wait (!%p1226_p5), %s1054_s9, 1024  }
 0x4de   : > { %1582 = vsyncadd (!%p1226_p5), %s1054_s9, 4294966272  ;;  %s22_s26 = sadd.s32 1, %s1625_s26   ;;  %s2213_s23 = sld [smem:[#allocation17_spill]] }
 0x4df   : > { %p19_p8 = scmp.ge.s32.totalorder %s22_s26, 6   ;;  %s2214_s24 = sld [smem:[#allocation19_spill]] }
 0x4e0   : > { %s2215_s17 = smov %s1589_s18  ;;  %s2216_s18 = smov %s1593_s19 }
 0x4e1   : > { %s2217_s19 = smov %s1846_s3  ;;  %s2218_s20 = smov %s1601_s21 }
 0x4e2   : > { %s2219_s21 = smov %s1605_s22  ;;  %s2220_s22 = smov %s1841_s14 }
 0x4e3   : > { %s2221_s0 = smov %s1621_s25  ;;  %s2222_s25 = smov %s2228_s16 }
 0x4e4   :  { %21 = sbr.rel (!%p19_p8) target bundleno = 14 (0xe), region = 95 }
 0x4eb   :  { %1059 = vsyncpa [#allocation7], 1 }
 0x4ec   :  { %1061 = vsyncpa [#allocation7 + $0x1], 1 }
 0x4ed   :  { %1062 = vsyncpa [#allocation10], 1 }
 0x4ee   :  { %1063 = vsyncpa [#allocation8], 1 }
 0x4ef   :  { %1065 = vsyncpa [#allocation8 + $0x1], 1 }

</bundles_post_ra>
